<compile_context>
chip_gen: v5e
topology: v5e:2x2
jax: 0.10.0
libtpu: 0.0.40
codegen_flags: <defaults>
</compile_context>

<pallas_src>
import functools

import jax
import jax.numpy as jnp
from jax.experimental import pallas as pl
from jax.experimental.pallas import tpu as pltpu


def _round_up(x, m):
    return ((x + m - 1) // m) * m


# --------------------------- chip-conditional knobs ---------------------------

def _vmem_capacity_bytes():
    try:
        return int(pltpu.get_tpu_info().vmem_capacity_bytes)
    except Exception:
        return 64 * 1024 * 1024              # conservative (v7x-safe) fallback


_VMEM_CAP = _vmem_capacity_bytes()
_VMEM_LIMIT = min(64 * 1024 * 1024, max(32 * 1024 * 1024, _VMEM_CAP // 2))
_TILE_BUDGET = int(_VMEM_LIMIT * 0.7)        # VMEM consumed by one matmul's tiles
_RESIDENT_B_BYTES = (12 if _VMEM_LIMIT >= 64 * 1024 * 1024 else 6) * 1024 * 1024
_BIG_K_TILE = 4096 if _VMEM_LIMIT >= 64 * 1024 * 1024 else 2048


# -------------------- Pallas matmul (bias + ReLU + cast fused) ----------------

def _mm_kernel_single(a_ref, b_ref, bias_ref, o_ref, *, relu):
    # Weight block fully VMEM-resident: single-shot matmul + epilogue.
    out = jnp.dot(a_ref[...], b_ref[...], preferred_element_type=jnp.float32)
    out = out + bias_ref[...]
    if relu:
        out = jnp.maximum(out, 0.0)
    o_ref[...] = out.astype(o_ref.dtype)


def _mm_kernel_tiled(a_ref, b_ref, bias_ref, o_ref, acc_ref, *, relu, nk):
    k = pl.program_id(2)

    @pl.when(k == 0)
    def _():
        acc_ref[...] = jnp.zeros_like(acc_ref)

    acc_ref[...] += jnp.dot(a_ref[...], b_ref[...],
                            preferred_element_type=jnp.float32)

    @pl.when(k == nk - 1)
    def _():
        out = acc_ref[...] + bias_ref[...]
        if relu:
            out = jnp.maximum(out, 0.0)
        o_ref[...] = out.astype(o_ref.dtype)


def _pick_tm(M, tk, tn, out_bytes, nk, budget):
    """Largest M tile keeping (double-buffered) tiles inside the VMEM budget."""
    def est(tm):
        return (2 * tm * tk * 2              # A blocks (bf16, double buffered)
                + 2 * tk * tn * 2            # B blocks (bf16)
                + 2 * tm * tn * out_bytes    # out blocks
                + (tm * tn * 4 if nk > 1 else 0)   # fp32 accumulator scratch
                + 2 * tn * 4)                # bias
    cap = _round_up(M, 8)
    if M >= 1024:                            # >=2 M blocks -> both v7x TCs busy
        cap = min(cap, _round_up((M + 1) // 2, 8))
    if cap <= 4096 and est(cap) <= budget:
        return cap
    tm = 8
    for cand in (16, 32, 64, 128, 256, 512, 1024, 2048, 4096):
        if cand >= cap:
            break
        if est(cand) <= budget:
            tm = cand
    return tm


def pallas_matmul_bias(a, b, bias, relu, out_dtype=jnp.float32):
    """out = cast((relu?)(a @ b + bias), out_dtype).  a:(M,K), b:(K,N), bias:(N,)."""
    M, K = a.shape
    K2, N = b.shape
    assert K == K2
    out_bytes = jnp.dtype(out_dtype).itemsize

    Kp = _round_up(K, 16)
    Np = _round_up(N, 128)
    if Kp * Np * 2 <= _RESIDENT_B_BYTES:
        tk, tn = Kp, Np                      # whole weight matrix VMEM-resident
    else:
        tk = min(_BIG_K_TILE, Kp)            # e_fc: tile K (chip-dependent size)
        Kp = _round_up(K, tk)
        tn = min(512, Np)                    # N=1024 -> nn=2 -> both v7x TCs
        Np = _round_up(N, tn)
    nk, nn = Kp // tk, Np // tn

    tm = _pick_tm(M, tk, tn, out_bytes, nk, _TILE_BUDGET)
    Mp = _round_up(M, tm)
    nm = Mp // tm

    a_p = a.astype(jnp.bfloat16)
    if (Mp, Kp) != (M, K):
        a_p = jnp.pad(a_p, ((0, Mp - M), (0, Kp - K)))
    b_p = b.astype(jnp.bfloat16)
    if (Kp, Np) != (K, N):
        b_p = jnp.pad(b_p, ((0, Kp - K), (0, Np - N)))
    bias_p = bias.astype(jnp.float32).reshape(1, N)
    if Np != N:
        bias_p = jnp.pad(bias_p, ((0, 0), (0, Np - N)))

    if nk == 1:
        kernel = functools.partial(_mm_kernel_single, relu=relu)
        scratch = []
    else:
        kernel = functools.partial(_mm_kernel_tiled, relu=relu, nk=nk)
        scratch = [pltpu.VMEM((tm, tn), jnp.float32)]

    out = pl.pallas_call(
        kernel,
        out_shape=jax.ShapeDtypeStruct((Mp, Np), out_dtype),
        grid=(nm, nn, nk),
        in_specs=[
            pl.BlockSpec((tm, tk), lambda i, j, k: (i, k)),
            pl.BlockSpec((tk, tn), lambda i, j, k: (k, j)),
            pl.BlockSpec((1, tn), lambda i, j, k: (0, j)),
        ],
        out_specs=pl.BlockSpec((tm, tn), lambda i, j, k: (i, j)),
        scratch_shapes=scratch,
        compiler_params=pltpu.CompilerParams(
            dimension_semantics=("parallel", "parallel", "arbitrary"),
            vmem_limit_bytes=_VMEM_LIMIT,
        ),
    )(a_p, b_p, bias_p)
    # TODO(synk): the (Mp,Np)->(M,N) crop stays in XLA; it generally fuses into
    # the consuming reshape and keeps masked partial stores out of the kernel.
    return out[:M, :N]


def linear(x, wmat, bias, relu, out_dtype):
    """x:(B,in), wmat:(in,out) pre-transposed bf16."""
    return pallas_matmul_bias(x, wmat, bias, relu=relu, out_dtype=out_dtype)


# ------------------------- Conv2d (NHWC, im2col) ------------------------------

def conv2d_nhwc(x, wmat, bias, *, kh, kw, stride, padding, relu,
                out_dtype=jnp.bfloat16):
    """x:(N,H,W,C), wmat:(kh*kw*C, O) with (ky,kx,c) row order."""
    N, H, W, C = x.shape
    if padding:
        x = jnp.pad(x, ((0, 0), (padding, padding), (padding, padding), (0, 0)))
    Hp, Wp = x.shape[1], x.shape[2]
    OH = (Hp - kh) // stride + 1
    OW = (Wp - kw) // stride + 1
    # TODO(synk): im2col window extraction stays in XLA (pure data movement,
    # no clean rectangular Pallas tiling).
    cols = []
    for i in range(kh):
        for j in range(kw):
            cols.append(x[:, i:i + stride * (OH - 1) + 1:stride,
                          j:j + stride * (OW - 1) + 1:stride, :])
    A = jnp.concatenate(cols, axis=-1).reshape(N * OH * OW, kh * kw * C)
    out = pallas_matmul_bias(A, wmat, bias, relu=relu, out_dtype=out_dtype)
    return out.reshape(N, OH, OW, wmat.shape[1])


# ------------- ConvTranspose2d (sub-pixel / s^2-phase decomposition) ----------

def conv_transpose2d_subpixel(x, wmat, bias_tiled, *, k, stride, padding, relu,
                              out_dtype=jnp.bfloat16):
    """x:(N,H,W,Cin); wmat:(T*T*Cin, s*s*Cout) sub-pixel layout (see prep).

    Each of the s^2 output phases is a stride-1 conv with a TxT tap kernel
    (T = ceil(k/s)); all phases share one im2col matrix and one Pallas matmul
    (bias + ReLU fused, fp32 accumulation).  The phase interleave + crop is a
    cheap reshape/transpose of the exact-size output.
    """
    N, H, W, Cin = x.shape
    s = stride
    T = -(-k // s)
    Cout = wmat.shape[1] // (s * s)
    xp = jnp.pad(x, ((0, 0), (T - 1, T - 1), (T - 1, T - 1), (0, 0)))
    OHp, OWp = H + T - 1, W + T - 1
    cols = []
    for ay in range(T):
        for ax in range(T):
            cols.append(xp[:, ay:ay + OHp, ax:ax + OWp, :])
    A = jnp.concatenate(cols, axis=-1).reshape(N * OHp * OWp, T * T * Cin)
    out = pallas_matmul_bias(A, wmat, bias_tiled, relu=relu, out_dtype=out_dtype)
    out = out.reshape(N, OHp, OWp, s, s, Cout)
    # TODO(synk): phase interleave/crop stays in XLA (pure data movement).
    out = jnp.transpose(out, (0, 1, 3, 2, 4, 5)).reshape(N, OHp * s, OWp * s, Cout)
    L = (H - 1) * s + k
    return out[:, padding:L - padding, padding:L - padding, :]


def conv_transpose2d_1x1(x, wmat, bias_tiled, *, k, relu, out_dtype=jnp.bfloat16):
    """ConvTranspose2d over a 1x1 spatial input (padding 0): single matmul +
    reshape.  wmat:(Cin, k*k*Cout), columns ordered (dy,dx,cout)."""
    N = x.shape[0]
    Cout = wmat.shape[1] // (k * k)
    out = pallas_matmul_bias(x.reshape(N, -1), wmat, bias_tiled,
                             relu=relu, out_dtype=out_dtype)
    return out.reshape(N, k, k, Cout)


# ------------------------------ parameter init --------------------------------

def _init_linear(key, in_f, out_f):
    kw_, kb = jax.random.split(key)
    s = 1.0 / jnp.sqrt(in_f)
    W = jax.random.uniform(kw_, (out_f, in_f), jnp.float32, -s, s)
    b = jax.random.uniform(kb, (out_f,), jnp.float32, -s, s)
    return W, b


def _init_conv(key, out_c, in_c, k):
    kw_, kb = jax.random.split(key)
    s = 1.0 / jnp.sqrt(in_c * k * k)
    W = jax.random.uniform(kw_, (out_c, in_c, k, k), jnp.float32, -s, s)
    b = jax.random.uniform(kb, (out_c,), jnp.float32, -s, s)
    return W, b


def _init_convT(key, in_c, out_c, k):
    kw_, kb = jax.random.split(key)
    s = 1.0 / jnp.sqrt(in_c * k * k)
    W = jax.random.uniform(kw_, (in_c, out_c, k, k), jnp.float32, -s, s)
    b = jax.random.uniform(kb, (out_c,), jnp.float32, -s, s)
    return W, b


def init_params(key, latent_dim):
    ks = jax.random.split(key, 13)
    return {
        "e_conv1": _init_conv(ks[0], 32, 3, 3),
        "e_conv2": _init_conv(ks[1], 64, 32, 3),
        "e_conv3": _init_conv(ks[2], 64, 64, 3),
        "e_fc": _init_linear(ks[3], 16 * 16 * 64, 1024),
        "e_fc_mean": _init_linear(ks[4], 1024, latent_dim),
        "e_fc_logvar": _init_linear(ks[5], 1024, latent_dim),
        "d_fc": _init_linear(ks[6], latent_dim, 1024),
        "d_ct1": _init_convT(ks[7], 1024, 64, 4),
        "d_ct2": _init_convT(ks[8], 64, 64, 4),
        "d_ct3": _init_convT(ks[9], 64, 64, 8),
        "d_ct4": _init_convT(ks[10], 64, 32, 8),
        "d_ct5": _init_convT(ks[11], 32, 32, 8),
        "d_ct6": _init_convT(ks[12], 32, 3, 8),
    }


# -------------------------- weight layout preparation -------------------------

def _prep_conv(wb):
    w, b = wb                                  # (O, C, kh, kw)
    O = w.shape[0]
    wm = jnp.transpose(w, (2, 3, 1, 0)).reshape(-1, O)
    return wm.astype(jnp.bfloat16), b.astype(jnp.float32)


def _prep_linear(wb):
    w, b = wb                                  # (out, in)
    return w.T.astype(jnp.bfloat16), b.astype(jnp.float32)


def _prep_convT_1x1(wb):
    w, b = wb                                  # (Cin, Cout, k, k)
    Cin, Cout, k, _ = w.shape
    wm = jnp.transpose(w, (0, 2, 3, 1)).reshape(Cin, k * k * Cout)
    return wm.astype(jnp.bfloat16), jnp.tile(b, k * k).astype(jnp.float32)


def _prep_convT_subpixel(w, b, stride):
    """(Cin,Cout,k,k) -> (T*T*Cin, s*s*Cout): rows ordered (ay,ax,cin), columns
    (ry,rx,cout), taps W[dy = ry + (T-1-ay)*s] (zero where dy >= k)."""
    Cin, Cout, k, _ = w.shape
    s = stride
    T = -(-k // s)
    wp = jnp.pad(w, ((0, 0), (0, 0), (0, T * s - k), (0, T * s - k)))
    wp = wp.reshape(Cin, Cout, T, s, T, s)      # (cin, cout, a_y, ry, a_x, rx)
    wp = wp[:, :, ::-1, :, ::-1, :]             # a -> T-1-a  (tap reversal)
    wm = jnp.transpose(wp, (2, 4, 0, 3, 5, 1)).reshape(T * T * Cin, s * s * Cout)
    return wm.astype(jnp.bfloat16), jnp.tile(b, s * s).astype(jnp.float32)


def prepare_params(p):
    """One-time (outside jit) weight rearrangement to matmul layout + bf16."""
    q = {
        "e_conv1": _prep_conv(p["e_conv1"]),
        "e_conv2": _prep_conv(p["e_conv2"]),
        "e_conv3": _prep_conv(p["e_conv3"]),
        "e_fc": _prep_linear(p["e_fc"]),
        "d_fc": _prep_linear(p["d_fc"]),
        "d_ct1": _prep_convT_1x1(p["d_ct1"]),
        "d_ct2": _prep_convT_subpixel(*p["d_ct2"], stride=2),
        "d_ct3": _prep_convT_subpixel(*p["d_ct3"], stride=2),
        "d_ct4": _prep_convT_subpixel(*p["d_ct4"], stride=2),
        "d_ct5": _prep_convT_subpixel(*p["d_ct5"], stride=3),
        "d_ct6": _prep_convT_subpixel(*p["d_ct6"], stride=3),
    }
    wm_mean, b_mean = _prep_linear(p["e_fc_mean"])
    wm_lv, b_lv = _prep_linear(p["e_fc_logvar"])
    # fuse fc_mean + fc_log_var into one matmul along N
    q["e_fc_ml"] = (jnp.concatenate([wm_mean, wm_lv], axis=1),
                    jnp.concatenate([b_mean, b_lv], axis=0))
    return q


# --------------------------------- VAE forward --------------------------------

@functools.partial(jax.jit, static_argnames=("latent_dim",))
def vae_forward(params, x, eps, *, latent_dim):
    # x: (N,3,H,W) NCHW (PyTorch convention) -> NHWC bf16 internally.
    xh = jnp.transpose(x, (0, 2, 3, 1)).astype(jnp.bfloat16)
    h = conv2d_nhwc(xh, *params["e_conv1"], kh=3, kw=3, stride=4, padding=1, relu=True)
    h = conv2d_nhwc(h, *params["e_conv2"], kh=3, kw=3, stride=4, padding=1, relu=True)
    h = conv2d_nhwc(h, *params["e_conv3"], kh=3, kw=3, stride=2, padding=1, relu=True)
    # flatten in PyTorch (C,H,W) order to match nn.Linear(16*16*64, ...)
    h = jnp.transpose(h, (0, 3, 1, 2)).reshape(h.shape[0], -1)
    h = linear(h, *params["e_fc"], relu=True, out_dtype=jnp.bfloat16)       # (B,1024)
    ml = linear(h, *params["e_fc_ml"], relu=False, out_dtype=jnp.float32)   # (B,2*latent)
    mean = ml[:, :latent_dim]
    log_var = ml[:, latent_dim:]
    # reparameterization (matches torch reference: mean + randn * exp(log_var))
    z = mean + eps * jnp.exp(log_var)

    d = linear(z, *params["d_fc"], relu=True, out_dtype=jnp.bfloat16)       # (B,1024)
    d = d.reshape(d.shape[0], 1, 1, 1024)
    d = conv_transpose2d_1x1(d, *params["d_ct1"], k=4, relu=True)                              # 4
    d = conv_transpose2d_subpixel(d, *params["d_ct2"], k=4, stride=2, padding=0, relu=True)    # 10
    d = conv_transpose2d_subpixel(d, *params["d_ct3"], k=8, stride=2, padding=0, relu=True)    # 26
    d = conv_transpose2d_subpixel(d, *params["d_ct4"], k=8, stride=2, padding=0, relu=True)    # 58
    d = conv_transpose2d_subpixel(d, *params["d_ct5"], k=8, stride=3, padding=0, relu=True)    # 179
    d = conv_transpose2d_subpixel(d, *params["d_ct6"], k=8, stride=3, padding=15, relu=False,
                                  out_dtype=jnp.float32)                                       # 512
    xhat = jnp.transpose(d, (0, 3, 1, 2))                                   # back to NCHW
    return xhat, mean, log_var


# ------------------------- small numerical self-check --------------------------

def _convT_reference(x, w, b, stride, padding):
    """Direct (scatter-add) ConvTranspose2d reference, NHWC, fp32."""
    N, H, W, Cin = x.shape
    Cout, k = w.shape[1], w.shape[2]
    Lh, Lw = (H - 1) * stride + k, (W - 1) * stride + k
    y = jnp.zeros((N, Lh, Lw, Cout), jnp.float32)
    for i in range(H):
        for j in range(W):
            c = jnp.einsum("nc,coyx->nyxo", x[:, i, j, :], w)
            y = y.at[:, i * stride:i * stride + k, j * stride:j * stride + k, :].add(c)
    y = y + b.reshape(1, 1, 1, Cout)
    return y[:, padding:Lh - padding, padding:Lw - padding, :]


def _self_test_conv_transpose():
    key = jax.random.PRNGKey(1)
    k1, k2, k3 = jax.random.split(key, 3)
    Cin, Cout, k, s, p = 8, 6, 8, 3, 2
    # bf16-round inputs/weights so the only mismatch is fp32 summation order.
    x = jax.random.normal(k1, (2, 5, 5, Cin), jnp.float32).astype(jnp.bfloat16)
    w = (jax.random.normal(k2, (Cin, Cout, k, k), jnp.float32) * 0.1
         ).astype(jnp.bfloat16).astype(jnp.float32)
    b = jax.random.normal(k3, (Cout,), jnp.float32) * 0.1
    wmat, bt = _prep_convT_subpixel(w, b, s)
    got = conv_transpose2d_subpixel(x, wmat, bt, k=k, stride=s, padding=p,
                                    relu=False, out_dtype=jnp.float32)
    ref = _convT_reference(x.astype(jnp.float32), w, b, s, p)
    err = float(jnp.max(jnp.abs(got - ref)))
    scale = float(jnp.max(jnp.abs(ref))) + 1e-6
    assert err <= 1e-2 * scale + 1e-4, (err, scale)


if __name__ == "__main__":
    _self_test_conv_transpose()

    key = jax.random.PRNGKey(0)
    k_params, k_x, k_eps = jax.random.split(key, 3)
    latent_dim = 16 ** 2
    batch = 1

    params = prepare_params(init_params(k_params, latent_dim))
    # Encoder fc expects 16*16*64 features -> input spatial must be 512x512.
    x = jax.random.normal(k_x, (batch, 3, 512, 512), jnp.float32)
    # torch.randn_like(mean) replaced by a deterministic JAX normal draw.
    eps = jax.random.normal(k_eps, (batch, latent_dim), jnp.float32)

    xhat, mean, log_var = vae_forward(params, x, eps, latent_dim=latent_dim)
    jax.block_until_ready((xhat, mean, log_var))

    assert xhat.shape == (batch, 3, 512, 512), xhat.shape
    assert mean.shape == (batch, latent_dim), mean.shape
    assert log_var.shape == (batch, latent_dim), log_var.shape
    assert bool(jnp.all(jnp.isfinite(xhat)))
    print("KERNEL_OK")
</pallas_src>

<mosaic_0001>
module attributes {stable_mosaic.version = 11 : i64} {
  func.func @_mm_kernel_single(%arg0: i32, %arg1: i32, %arg2: i32, %arg3: memref<104x80xbf16, #tpu.memory_space<vmem>>, %arg4: memref<80x128xbf16, #tpu.memory_space<vmem>>, %arg5: memref<1x128xf32, #tpu.memory_space<vmem>>, %arg6: memref<104x128xf32, #tpu.memory_space<vmem>>) attributes {dimension_semantics = [#tpu.dimension_semantics<parallel>, #tpu.dimension_semantics<parallel>, #tpu.dimension_semantics<arbitrary>], iteration_bounds = array<i64: 1, 1, 1>, scalar_prefetch = 0 : i64, scratch_operands = 0 : i64, tpu.core_type = #tpu.core_type<tc>, window_params = [{transform_indices = @transform_0, window_bounds = array<i64: 104, 80>}, {transform_indices = @transform_1, window_bounds = array<i64: 80, 128>}, {transform_indices = @transform_2, window_bounds = array<i64: 1, 128>}, {transform_indices = @transform_3, window_bounds = array<i64: 104, 128>}]} {
    %c0 = arith.constant 0 : index
    %c0_0 = arith.constant 0 : index
    %0 = vector.load %arg3[%c0, %c0_0] : memref<104x80xbf16, #tpu.memory_space<vmem>>, vector<104x80xbf16>
    %c0_1 = arith.constant 0 : index
    %c0_2 = arith.constant 0 : index
    %1 = vector.load %arg4[%c0_1, %c0_2] : memref<80x128xbf16, #tpu.memory_space<vmem>>, vector<80x128xbf16>
    %cst = arith.constant dense<0.000000e+00> : vector<104x128xf32>
    %2 = tpu.matmul %0, %1, %cst {dimension_numbers = #tpu.dot_dimension_numbers<[1], [0], [0], [1], [0, 0, 1, 1], [], []>} : vector<104x80xbf16>, vector<80x128xbf16>, vector<104x128xf32> -> vector<104x128xf32>
    %c0_3 = arith.constant 0 : index
    %c0_4 = arith.constant 0 : index
    %3 = vector.load %arg5[%c0_3, %c0_4] : memref<1x128xf32, #tpu.memory_space<vmem>>, vector<1x128xf32>
    %4 = vector.broadcast %3 : vector<1x128xf32> to vector<104x128xf32>
    %5 = arith.addf %2, %4 : vector<104x128xf32>
    %c0_5 = arith.constant 0 : index
    %c0_6 = arith.constant 0 : index
    %6 = vector.load %arg6[%c0_5, %c0_6] : memref<104x128xf32, #tpu.memory_space<vmem>>, vector<104x128xf32>
    tpu.vector_store %arg6[%c0_5, %c0_6], %5 {strides = array<i32>} : memref<104x128xf32, #tpu.memory_space<vmem>>, vector<104x128xf32>,
    return
  }
  func.func @transform_0(%arg0: i32, %arg1: i32, %arg2: i32) -> (i32, i32) {
    %c0_i32 = arith.constant 0 : i32
    return %arg0, %arg2 : i32, i32
  }
  func.func @transform_1(%arg0: i32, %arg1: i32, %arg2: i32) -> (i32, i32) {
    %c0_i32 = arith.constant 0 : i32
    return %arg2, %arg1 : i32, i32
  }
  func.func @transform_2(%arg0: i32, %arg1: i32, %arg2: i32) -> (i32, i32) {
    %c0_i32 = arith.constant 0 : i32
    %c0_i32_0 = arith.constant 0 : i32
    return %c0_i32, %arg1 : i32, i32
  }
  func.func @transform_3(%arg0: i32, %arg1: i32, %arg2: i32) -> (i32, i32) {
    %c0_i32 = arith.constant 0 : i32
    return %arg0, %arg1 : i32, i32
  }
}

</mosaic_0001>

<bundles_post_ra>
// kernel: tpu_custom_call.1
= control target key start
LH: loop header
LB: loop body
LE: loop exit
PB: predicated region body
PF: predicated region fallthrough
CT: control target
= control target key end

     0   :  { %s381_s0 = inlined_call_operand.vmem [shape: bf16[104,80], index: 0, kind: input, shape index: {}]   ;;  %s382_s1 = inlined_call_operand.vmem [shape: bf16[80,128], index: 1, kind: input, shape index: {}]   ;;  %s383_s2 = inlined_call_operand.vmem [shape: f32[1,128], index: 2, kind: input, shape index: {}]   ;;  %s384_s3 = inlined_call_operand.hbm [shape: f32[104,128], index: 3, kind: output, shape index: {}]  }
   0x1   :  { %v263_v0 = vld [vmem:[%s382_s1 + $0x20] sm:$0xff]  ;;  %v262_v1 = vld [vmem:[%s382_s1 + $0x18] sm:$0xff] }
   0x2   :  { %131 = vmatpush.bf16.msra.mxu0 %v263_v0  ;;  %264 = vmatpush.bf16.msra.mxu1 %v263_v0 }
   0x3   :  { %266 = vmatpush.bf16.msra.mxu3 %v263_v0  ;;  %265 = vmatpush.bf16.msra.mxu2 %v263_v0 }
   0x4   :  { %8 = vsyncpa [#allocation3], 0  ;;  %v261_v2 = vld [vmem:[%s382_s1 + $0x10] sm:$0xff]  ;;  %v260_v3 = vld [vmem:[%s382_s1 + $0x8] sm:$0xff]  ;;  %vm106_vm0 = vcmask 654336   ;;  %s190_s12 = sshll.u32 %s384_s3, 4  ;;  %s191_s12 = int_to_ptr.hbm [resolvable:$true] %s190_s12 }
   0x5   :  { %v259_v4 = vld [vmem:[%s382_s1] sm:$0xff]  ;;  %v255_v6 = vld [vmem:[%s381_s0 + $0x10] sm:$0xff]  ;;  %v258_v7 = vld [vmem:[%s381_s0 + $0x28] sm:$0xff]  ;;  %s310_s13 = smov 128   ;;  %s311_s14 = smov 8  }
   0x6   :  { %132 = vmatpush.bf16.msra.mxu0 %v262_v1  ;;  %267 = vmatpush.bf16.msra.mxu1 %v262_v1  ;;  %v253_v5 = vld [vmem:[%s381_s0] sm:$0xff]  ;;  %v28_v9 = vld [vmem:[%s381_s0 + $0x30] sm:$0xf]  ;;  %v254_v11 = vld [vmem:[%s381_s0 + $0x8] sm:$0xff] }
   0x7   :  { %269 = vmatpush.bf16.msra.mxu3 %v262_v1  ;;  %268 = vmatpush.bf16.msra.mxu2 %v262_v1  ;;  %v257_v8 = vld [vmem:[%s381_s0 + $0x20] sm:$0xff]  ;;  %v68_v10 = vunpack.c.l.b16 %v28_v9  ;;  %v256_v12 = vld [vmem:[%s381_s0 + $0x18] sm:$0xff]  ;;  %s309_s0 = smov [#allocation2]  }
   0x8   :  { %v282_v14 = vld [vmem:[%s383_s2] ss:$0 sm:$0xff]  ;;  %s188_s2 = sshll.u32 %s309_s0, 4  ;;  %s189_s2 = int_to_ptr.vmem [resolvable:$true] %s188_s2 }
   0x9   :  { %v75_v13 = vpack.c.b16 %v68_v10, %v68_v10 }
   0xa   :  { %133 = vmatpush.bf16.msra.mxu0 %v261_v2  ;;  %270 = vmatpush.bf16.msra.mxu1 %v261_v2 }
   0xb   :  { %272 = vmatpush.bf16.msra.mxu3 %v261_v2  ;;  %271 = vmatpush.bf16.msra.mxu2 %v261_v2 }
   0xe   :  { %134 = vmatpush.bf16.msra.mxu0 %v260_v3  ;;  %273 = vmatpush.bf16.msra.mxu1 %v260_v3 }
   0xf   :  { %275 = vmatpush.bf16.msra.mxu3 %v260_v3  ;;  %274 = vmatpush.bf16.msra.mxu2 %v260_v3 }
  0x12   :  { %135 = vmatpush.bf16.msra.mxu0 %v259_v4  ;;  %276 = vmatpush.bf16.msra.mxu1 %v259_v4 }
  0x13   :  { %278 = vmatpush.bf16.msra.mxu3 %v259_v4  ;;  %277 = vmatpush.bf16.msra.mxu2 %v259_v4 }
  0x15   :  { %246 = vmatmul.msk.bf16.vlgmr.msra.gmra.mxu0 %vm106_vm0, %v253_v5  ;;  %248 = vmatmul.msk.bf16.vlgmr.msra.gmra.mxu1 %vm106_vm0, %v255_v6 }
  0x16   :  { %251 = vmatmul.msk.bf16.vlgmr.msra.gmra.mxu3 %vm106_vm0, %v258_v7  ;;  %250 = vmatmul.msk.bf16.vlgmr.msra.gmra.mxu2 %vm106_vm0, %v257_v8 }
  0x25   :  { %247 = vmatmul.msk.bf16.gmra.mxu0 %vm106_vm0, %v254_v11  ;;  %249 = vmatmul.msk.bf16.gmra.mxu1 %vm106_vm0, %v256_v12 }
  0x26   :  { %252 = vmatmul.msk.bf16.gmra.mxu3 %vm106_vm0, %v75_v13 }
  0x92   :  { %v137_v15 = vpop.f32.mrf.mxu0  ;;  %v147_v16 = vpop.f32.mrf.mxu1 }
  0x93   :  { %v138_v17 = vadd.f32 %v282_v14, %v137_v15  ;;  %v148_v18 = vadd.f32 %v282_v14, %v147_v16 }
  0x95   :  { %171 = vst [vmem:[#allocation2] sm:$0xff] %v138_v17 }
  0x96   :  { %175 = vst [vmem:[#allocation2 + $0x20] sm:$0xff] %v148_v18 }
  0x99   :  { %v162_v19 = vpop.f32.mrf.mxu3  ;;  %v157_v20 = vpop.f32.mrf.mxu2 }
  0x9a   :  { %v163_v21 = vadd.f32 %v282_v14, %v162_v19  ;;  %v139_v22 = vpop.f32.mrf.mxu0  ;;  %v149_v23 = vpop.f32.mrf.mxu1  ;;  %v158_v26 = vadd.f32 %v282_v14, %v157_v20 }
  0x9b   :  { %v140_v24 = vadd.f32 %v282_v14, %v139_v22  ;;  %v150_v25 = vadd.f32 %v282_v14, %v149_v23 }
  0x9c   :  { %181 = vst [vmem:[#allocation2 + $0x50] sm:$0xff] %v163_v21 }
  0x9d   :  { %172 = vst [vmem:[#allocation2 + $0x8] sm:$0xff] %v140_v24 }
  0x9e   :  { %176 = vst [vmem:[#allocation2 + $0x28] sm:$0xff] %v150_v25 }
  0x9f   :  { %179 = vst [vmem:[#allocation2 + $0x40] sm:$0xff] %v158_v26 }
  0xa1   :  { %v164_v27 = vpop.f32.mrf.mxu3  ;;  %v159_v28 = vpop.f32.mrf.mxu2 }
  0xa2   :  { %v165_v29 = vadd.f32 %v282_v14, %v164_v27  ;;  %v142_v30 = vpop.f32.mrf.mxu0  ;;  %v152_v31 = vpop.f32.mrf.mxu1  ;;  %v160_v34 = vadd.f32 %v282_v14, %v159_v28 }
  0xa3   :  { %v143_v32 = vadd.f32 %v282_v14, %v142_v30  ;;  %v153_v33 = vadd.f32 %v282_v14, %v152_v31 }
  0xa4   :  { %182 = vst [vmem:[#allocation2 + $0x58] sm:$0xff] %v165_v29 }
  0xa5   :  { %173 = vst [vmem:[#allocation2 + $0x10] sm:$0xff] %v143_v32 }
  0xa6   :  { %177 = vst [vmem:[#allocation2 + $0x30] sm:$0xff] %v153_v33 }
  0xa7   :  { %180 = vst [vmem:[#allocation2 + $0x48] sm:$0xff] %v160_v34 }
  0xa9   :  { %v167_v35 = vpop.f32.mrf.mxu3 }
  0xaa   :  { %v168_v36 = vadd.f32 %v282_v14, %v167_v35  ;;  %v144_v37 = vpop.f32.mrf.mxu0  ;;  %v154_v38 = vpop.f32.mrf.mxu1 }
  0xab   :  { %v145_v39 = vadd.f32 %v282_v14, %v144_v37  ;;  %v155_v40 = vadd.f32 %v282_v14, %v154_v38 }
  0xac   :  { %183 = vst [vmem:[#allocation2 + $0x60] sm:$0xff] %v168_v36 }
  0xad   :  { %174 = vst [vmem:[#allocation2 + $0x18] sm:$0xff] %v145_v39 }
  0xae   :  { %178 = vst [vmem:[#allocation2 + $0x38] sm:$0xff] %v155_v40 }
  0xaf   :  { %196 = dma.vmem_to_hbm [thread:$0]  %s189_s2, 1664, %s191_s12, [#allocation3], %s310_s13, %s310_s13, %s311_s14  }
  0xb1   :  { %v169_v41 = vpop.f32.mrf.mxu3 }
  0xb2   :  { %307 = dma.done.wait [#allocation3], 1664  }
  0xb3   :  { %308 = vsyncadd [#allocation3], 4294965632 }
  0xb4   :  { %201 = vsyncpa [#allocation3], 1 }

</bundles_post_ra>
